<compile_context>
chip_gen: v6e
topology: v6e:2x2x1
jax: 0.10.0
libtpu: 0.0.40
codegen_flags: <defaults>
</compile_context>

<pallas_src>
import functools

import jax
import jax.numpy as jnp
import numpy as np
from jax import lax
from jax.experimental import pallas as pl
from jax.experimental.pallas import tpu as pltpu

LANES = 128  # TPU lane width: all activations / weights are padded to 128 channels.

# VGG19 cfg 'E' truncated to features[:29], channels scaled 64->8 etc.
CFG = [8, 8, 'M', 16, 16, 'M', 32, 32, 32, 32, 'M', 64, 64, 64, 64, 'M', 64]
FEATURE_IDS = (0, 5, 10, 19, 28)  # model indices collected by VGG.forward

# The 13 convs grouped into 5 fused stages:
# (first conv idx, last conv idx + 1, trailing ReLU, fused 2x2 max-pool)
STAGES = (
    (0, 2, True, True),     # norm + conv0,conv1 (+ReLU) + pool    @ 32x32
    (2, 4, True, True),     # conv2,conv3 + pool                   @ 16x16
    (4, 8, True, True),     # conv4..conv7 + pool                  @ 8x8
    (8, 12, True, True),    # conv8..conv11 + pool                 @ 4x4
    (12, 13, False, False), # conv12 = model idx 29 (no ReLU, output not collected) @ 2x2
)


def _round_up(v, m):
    return (v + m - 1) // m * m


# --------------------------------------------------------------------------- #
# pltpu.roll direction probe (tiny one-off kernel, resolves the sign convention
# so the in-kernel window shifts are guaranteed to match jnp.roll semantics).
# --------------------------------------------------------------------------- #
@functools.lru_cache(maxsize=None)
def _roll_sign():
    """Returns +1 if pltpu.roll matches jnp.roll (out[i] = x[i - shift]), else -1."""
    def k(x_ref, o_ref):
        o_ref[...] = pltpu.roll(x_ref[...], 1, 0)

    x = jnp.tile(jnp.arange(8, dtype=jnp.float32)[:, None], (1, LANES))
    y = pl.pallas_call(
        k,
        out_shape=jax.ShapeDtypeStruct((8, LANES), jnp.float32),
        in_specs=[pl.BlockSpec(memory_space=pltpu.MemorySpace.VMEM)],
        out_specs=pl.BlockSpec(memory_space=pltpu.MemorySpace.VMEM),
    )(x)
    return 1 if float(y[1, 0]) == 0.0 else -1


def _shifted(x, s):
    """Row-shifted copy: out[r] = x[r + s] (circular; wrap only reaches rows that
    are zero padding / filler or never read by downstream selections)."""
    m = x.shape[0]
    if s == 0:
        return x
    shift = (-s * _roll_sign()) % m
    return x if shift == 0 else pltpu.roll(x, shift, 0)


# --------------------------------------------------------------------------- #
# Fused stage kernel: [normalization] + N x (3x3 conv + bias + ReLU) [+ 2x2 pool]
# Activation layout inside the kernel: one image as a "padded-flat" (P8, 128)
# block -- rows are the zero-bordered (H+2)x(W+2) pixels (row-major), channels
# are the 128 lanes, rows padded with zeros up to a multiple of 8.
# --------------------------------------------------------------------------- #
def _conv3x3_fused(x, w_ref, b_ref, mask, row_stride, do_relu):
    """3x3 conv (+bias, optional ReLU) on one padded-flat image block.

    The 3x3 window is realized as 9 row-rolled copies of the activation feeding
    the MXU ((P8,128)@(128,128) f32 dots), so no im2col tensor ever touches HBM.
    Circular wrap from the roll only reaches rows with mask == 0 (the zero
    padding border / filler rows), so it never affects interior outputs.
    """
    acc = jnp.zeros(x.shape, jnp.float32)
    tap = 0
    for dy in (-1, 0, 1):
        for dx in (-1, 0, 1):
            xs = _shifted(x, dy * row_stride + dx)
            acc = acc + jnp.dot(xs, w_ref[tap], preferred_element_type=jnp.float32)
            tap += 1
    y = acc + b_ref[...]
    if do_relu:
        y = jnp.maximum(y, 0.0)
    return y * mask                                  # re-zero padding / filler rows


def _make_stage_kernel(num_convs, with_norm, final_relu, with_pool, width):
    row_stride = width + 2

    def kernel(*refs):
        k = 0
        x_ref = refs[k]; k += 1
        mask_ref = refs[k]; k += 1
        if with_norm:
            mean_ref, inv_std_ref = refs[k], refs[k + 1]; k += 2
        w_refs = refs[k:k + num_convs]; k += num_convs
        b_refs = refs[k:k + num_convs]; k += num_convs
        if with_pool:
            sel_ref = refs[k]; k += 1
        if with_norm:
            feat_ref = refs[k]; k += 1
        out_ref = refs[k]

        mask = mask_ref[...]                         # (P8, 1) 1.0 on interior pixels
        x = x_ref[...]                               # (P8, 128)
        if with_norm:
            # (x - mean) / std fused here; its result is feature 0 (no extra pass).
            x = (x - mean_ref[...]) * inv_std_ref[...] * mask
            feat_ref[...] = x
        for ci in range(num_convs):
            do_relu = final_relu if ci == num_convs - 1 else True
            x = _conv3x3_fused(x, w_refs[ci], b_refs[ci], mask, row_stride, do_relu)

        if with_pool:
            # 2x2/stride-2 max pool, fully in-kernel:
            #   m2[r] = max over the 2x2 window whose top-left padded-flat row is r.
            m1 = jnp.maximum(x, _shifted(x, 1))              # horizontal pair max
            m2 = jnp.maximum(m1, _shifted(m1, row_stride))   # vertical pair max
            # Static 0/1 selection matrix gathers the stride-2 window maxima and
            # scatters them straight into the next stage's padded-flat layout
            # (zero border / filler rows come from the selector's zero rows).
            k_pad = sel_ref.shape[1] - m2.shape[0]
            if k_pad:
                m2 = jnp.concatenate(
                    [m2, jnp.zeros((k_pad, LANES), jnp.float32)], axis=0)
            out_ref[...] = jnp.dot(sel_ref[...], m2,
                                   preferred_element_type=jnp.float32)
        else:
            out_ref[...] = x

    return kernel


# --------------------------------------------------------------------------- #
# Host-side layout helpers (cheap XLA glue around the 5 stage kernels).
# --------------------------------------------------------------------------- #
@functools.lru_cache(maxsize=None)
def _interior_mask_np(h, w):
    p = (h + 2) * (w + 2)
    p8 = _round_up(p, 8)
    img = np.zeros((h + 2, w + 2), np.float32)
    img[1:h + 1, 1:w + 1] = 1.0
    m = np.zeros((p8, 1), np.float32)
    m[:p, 0] = img.reshape(-1)
    return m


@functools.lru_cache(maxsize=None)
def _pool_select_matrix_np(h, w):
    """0/1 matrix S s.t. pooled_padded_flat = S @ window_maxes (padded-flat @ HxW).

    Columns are zero-padded up to a multiple of 128 so the in-kernel matmul has
    a fully lane-aligned contraction dimension.
    """
    rs_in = w + 2
    p_in = (h + 2) * (w + 2)
    p_in_128 = _round_up(p_in, LANES)
    h2, w2 = h // 2, w // 2
    rs_out = w2 + 2
    p_out = (h2 + 2) * (w2 + 2)
    p8_out = _round_up(p_out, 8)
    s = np.zeros((p8_out, p_in_128), np.float32)
    for i in range(h2):
        for j in range(w2):
            r_out = (i + 1) * rs_out + (j + 1)
            r_in = (2 * i + 1) * rs_in + (2 * j + 1)   # top-left of the 2x2 window
            s[r_out, r_in] = 1.0
    return s


def _to_padded_flat(x):
    """(N, H, W, 128) -> (N * P8, 128): zero spatial border, flatten, pad rows to 8."""
    n, h, w, c = x.shape
    p = (h + 2) * (w + 2)
    p8 = _round_up(p, 8)
    xp = jnp.pad(x, ((0, 0), (1, 1), (1, 1), (0, 0)))
    flat = xp.reshape(n, p, c)
    flat = jnp.pad(flat, ((0, 0), (0, p8 - p), (0, 0)))
    return flat.reshape(n * p8, c)


def _from_padded_flat(flat, n, h, w):
    """(N * P8, 128) -> (N, H, W, 128) interior pixels."""
    p = (h + 2) * (w + 2)
    p8 = _round_up(p, 8)
    x = flat.reshape(n, p8, LANES)[:, :p, :].reshape(n, h + 2, w + 2, LANES)
    return x[:, 1:h + 1, 1:w + 1, :]


def _run_stage(flat, n, height, width, ws, bs, with_norm, final_relu, with_pool,
               norm_consts=None):
    p8_in = _round_up((height + 2) * (width + 2), 8)
    if with_pool:
        h_out, w_out = height // 2, width // 2
    else:
        h_out, w_out = height, width
    p8_out = _round_up((h_out + 2) * (w_out + 2), 8)
    num_convs = len(ws)
    kernel = _make_stage_kernel(num_convs, with_norm, final_relu, with_pool, width)

    act_in_spec = pl.BlockSpec((p8_in, LANES), lambda i: (i, 0))   # one image / step
    rep2 = lambda i: (0, 0)

    inputs = [flat, jnp.asarray(_interior_mask_np(height, width))]
    in_specs = [act_in_spec, pl.BlockSpec((p8_in, 1), rep2)]
    if with_norm:
        inputs += list(norm_consts)
        in_specs += [pl.BlockSpec((1, LANES), rep2)] * 2
    inputs += list(ws) + list(bs)
    in_specs += [pl.BlockSpec((9, LANES, LANES), lambda i: (0, 0, 0))] * num_convs
    in_specs += [pl.BlockSpec((1, LANES), rep2)] * num_convs
    if with_pool:
        sel = jnp.asarray(_pool_select_matrix_np(height, width))
        inputs.append(sel)
        in_specs.append(pl.BlockSpec(sel.shape, rep2))

    act_out_spec = pl.BlockSpec((p8_out, LANES), lambda i: (i, 0))
    act_out_shape = jax.ShapeDtypeStruct((n * p8_out, LANES), jnp.float32)
    if with_norm:
        feat_spec = pl.BlockSpec((p8_in, LANES), lambda i: (i, 0))
        feat_shape = jax.ShapeDtypeStruct((n * p8_in, LANES), jnp.float32)
        out_shape = (feat_shape, act_out_shape)
        out_specs = (feat_spec, act_out_spec)
    else:
        out_shape = act_out_shape
        out_specs = act_out_spec

    return pl.pallas_call(
        kernel,
        grid=(n,),
        in_specs=in_specs,
        out_specs=out_specs,
        out_shape=out_shape,
        compiler_params=pltpu.CompilerParams(
            dimension_semantics=("parallel",),       # images are independent (megacore)
            vmem_limit_bytes=32 * 1024 * 1024),
    )(*inputs)


# ------------------------------ model params -------------------------------- #
def init_params(key):
    """Deterministic synthetic conv weights (He init) for the scaled CFG."""
    params = []
    cin = 3
    k = key
    for v in CFG:
        if v == 'M':
            continue
        k, kw, kb = jax.random.split(k, 3)
        fan_in = 9 * cin
        w = jax.random.normal(kw, (3, 3, cin, v), jnp.float32) * jnp.sqrt(2.0 / fan_in)
        b = jax.random.normal(kb, (v,), jnp.float32) * 0.05
        params.append((w, b))
        cin = v
    return params


def _pad_conv_params(w, b):
    cin, cout = w.shape[2], w.shape[3]
    wp = jnp.zeros((3, 3, LANES, LANES), jnp.float32).at[:, :, :cin, :cout].set(w)
    bp = jnp.zeros((1, LANES), jnp.float32).at[0, :cout].set(b)
    return wp.reshape(9, LANES, LANES), bp


# ------------------------------ Pallas forward ------------------------------ #
def vgg_forward(x_nchw, conv_params, mean, std):
    """Pallas implementation of VGG.forward -> list of 5 NCHW feature maps."""
    n, c_in, h, w = x_nchw.shape
    x = jnp.transpose(x_nchw, (0, 2, 3, 1)).astype(jnp.float32)   # NHWC
    x = jnp.pad(x, ((0, 0), (0, 0), (0, 0), (0, LANES - c_in)))   # lane-dense channels

    packed = [_pad_conv_params(wc, bc) for wc, bc in conv_params]
    mean_p = jnp.concatenate(
        [mean, jnp.zeros((LANES - c_in,), jnp.float32)]).reshape(1, LANES)
    inv_std_p = jnp.concatenate(
        [1.0 / std, jnp.ones((LANES - c_in,), jnp.float32)]).reshape(1, LANES)

    features = []
    flat = _to_padded_flat(x)
    for si, (lo, hi, final_relu, with_pool) in enumerate(STAGES):
        with_norm = (si == 0)
        ws = [packed[i][0] for i in range(lo, hi)]
        bs = [packed[i][1] for i in range(lo, hi)]
        outs = _run_stage(flat, n, h, w, ws, bs, with_norm, final_relu, with_pool,
                          norm_consts=(mean_p, inv_std_p) if with_norm else None)
        if with_norm:
            feat0_flat, out_flat = outs
            features.append(_from_padded_flat(feat0_flat, n, h, w)[..., :c_in])
        else:
            out_flat = outs
        if with_pool:
            h, w = h // 2, w // 2
            c_true = conv_params[hi - 1][0].shape[3]
            # Pooled activation is already in the next stage's padded-flat layout;
            # it doubles as the collected max-pool feature.
            features.append(_from_padded_flat(out_flat, n, h, w)[..., :c_true])
            flat = out_flat
        # The last stage (model index 29 conv) is traced for fidelity with the
        # PyTorch forward; its output is not collected (XLA may DCE it).
    return [jnp.transpose(f, (0, 3, 1, 2)) for f in features]     # back to NCHW


# --------------------------- pure-JAX reference ----------------------------- #
def _build_layers():
    layers = [('norm',)]
    conv_i = 0
    for v in CFG:
        if v == 'M':
            layers.append(('pool',))
        else:
            layers.append(('conv', conv_i))
            layers.append(('relu',))
            conv_i += 1
    return layers[:30]   # model = [Normalization] + vgg19.features[:29]


LAYERS = _build_layers()


def vgg_forward_ref(x_nchw, conv_params, mean, std):
    x = jnp.transpose(x_nchw, (0, 2, 3, 1))
    features = []
    for layer_num, layer in enumerate(LAYERS):
        kind = layer[0]
        if kind == 'norm':
            x = (x - mean.reshape(1, 1, 1, -1)) / std.reshape(1, 1, 1, -1)
        elif kind == 'conv':
            wc, bc = conv_params[layer[1]]
            x = lax.conv_general_dilated(
                x, wc, (1, 1), ((1, 1), (1, 1)),
                dimension_numbers=('NHWC', 'HWIO', 'NHWC')) + bc.reshape(1, 1, 1, -1)
        elif kind == 'relu':
            x = jnp.maximum(x, 0.0)
        else:
            x = lax.reduce_window(x, -jnp.inf, lax.max,
                                  (1, 2, 2, 1), (1, 2, 2, 1), 'VALID')
        if layer_num in FEATURE_IDS:
            features.append(x)
    return [jnp.transpose(f, (0, 3, 1, 2)) for f in features]


# ---------------------------------- main ------------------------------------ #
if __name__ == "__main__":
    _roll_sign()   # resolve pltpu.roll direction once, before tracing the model

    key = jax.random.PRNGKey(0)
    kx, kp = jax.random.split(key)

    x = jax.random.uniform(kx, (2, 3, 32, 32), jnp.float32)   # NCHW, image-like [0,1)
    params = init_params(kp)
    cnn_mean = jnp.array([0.485, 0.456, 0.406], jnp.float32)
    cnn_std = jnp.array([0.229, 0.224, 0.225], jnp.float32)

    feats = jax.jit(vgg_forward)(x, params, cnn_mean, cnn_std)
    feats = jax.block_until_ready(feats)

    ref_feats = vgg_forward_ref(x, params, cnn_mean, cnn_std)
    assert len(feats) == 5
    for f, r in zip(feats, ref_feats):
        assert f.shape == r.shape and f.dtype == r.dtype
        np.testing.assert_allclose(np.asarray(f), np.asarray(r), rtol=2e-3, atol=2e-3)

    print("KERNEL_OK")
</pallas_src>

<mosaic_0001>
module attributes {stable_mosaic.version = 11 : i64} {
  func.func @k(%arg0: memref<8x128xf32, #tpu.memory_space<vmem>>, %arg1: memref<8x128xf32, #tpu.memory_space<vmem>>) attributes {dimension_semantics = [], scalar_prefetch = 0 : i64, scratch_operands = 0 : i64, tpu.core_type = #tpu.core_type<tc>} {
    %c0 = arith.constant 0 : index
    %c0_0 = arith.constant 0 : index
    %0 = vector.load %arg0[%c0, %c0_0] : memref<8x128xf32, #tpu.memory_space<vmem>>, vector<8x128xf32>
    %c1_i32 = arith.constant 1 : i32
    %1 = tpu.dynamic_rotate %0 by %c1_i32 dim 0 : vector<8x128xf32>, i32 -> vector<8x128xf32>
    %c0_1 = arith.constant 0 : index
    %c0_2 = arith.constant 0 : index
    %2 = vector.load %arg1[%c0_1, %c0_2] : memref<8x128xf32, #tpu.memory_space<vmem>>, vector<8x128xf32>
    tpu.vector_store %arg1[%c0_1, %c0_2], %1 {strides = array<i32>} : memref<8x128xf32, #tpu.memory_space<vmem>>, vector<8x128xf32>,
    return
  }
}

</mosaic_0001>

<bundles_post_ra>
// kernel: tpu_custom_call.1
= control target key start
LH: loop header
LB: loop body
LE: loop exit
PB: predicated region body
PF: predicated region fallthrough
CT: control target
= control target key end

     0   :  { %6 = vsyncpa [#allocation3], 0  ;;  %s103_s0 = inlined_call_operand.hbm [shape: f32[8,128], index: 0, kind: input, shape index: {}]   ;;  %s104_s1 = inlined_call_operand.hbm [shape: f32[8,128], index: 1, kind: output, shape index: {}]  }
   0x1   :  { %7 = vsyncpa [#allocation4], 0  ;;  %s85_s6 = smov [#allocation2]  }
   0x2   :  { %s14_s7 = sshll.u32 %s85_s6, 4  ;;  %s15_s7 = int_to_ptr.vmem [resolvable:$true] %s14_s7 }
   0x3   :  { %s49_s8 = scalar_lea.vmem %s15_s7, 128  ;;  %p54_p1 = scmp.lt.s32.totalorder %s15_s7, %s15_s7 }
   0x4   :  { %p50_p0 = scmp.ne.s32.totalorder %s15_s7, %s49_s8  ;;  %p55_p2 = scmp.lt.s32.totalorder %s49_s8, %s49_s8 }
   0x6   :  { %p56_p3 = por %p55_p2, %p54_p1 }
   0x8   :  { %p57_p4 = pnand %p56_p3, %p50_p0 }
   0xa   :  { %60 = shalt.err (!%p57_p4)
}
   0xb   :  { %17 = dma.hbm_to_vmem [thread:$0]  %s103_s0, 128, %s15_s7, [#allocation3]  }
   0xc   :  { %81 = dma.done.wait [#allocation3], 128  }
   0xd   :  { %82 = vsyncadd [#allocation3], 4294967168  ;;  %s86_s11 = smov [#allocation5]   ;;  %v21_v0 = vld [vmem:[#allocation2] sm:$0xff] }
   0xe   :  { %s30_s12 = sshll.u32 %s86_s11, 4  ;;  %v22_v1 = vrot.slane %v21_v0, 7  ;;  %s31_s12 = int_to_ptr.vmem [resolvable:$true] %s30_s12 }
   0xf   :  { %s61_s13 = scalar_lea.vmem %s31_s12, 128  ;;  %p66_p6 = scmp.lt.s32.totalorder %s31_s12, %s31_s12 }
  0x10   :  { %23 = vst [vmem:[#allocation5] sm:$0xff] %v22_v1  ;;  %p62_p5 = scmp.ne.s32.totalorder %s31_s12, %s61_s13  ;;  %p67_p7 = scmp.lt.s32.totalorder %s61_s13, %s61_s13 }
  0x12   :  { %p68_p8 = por %p67_p7, %p66_p6 }
  0x14   :  { %p69_p9 = pnand %p68_p8, %p62_p5 }
  0x16   :  { %72 = shalt.err (!%p69_p9)
}
  0x17   :  { %33 = dma.vmem_to_hbm [thread:$0]  %s31_s12, 128, %s104_s1, [#allocation4]  }
  0x18   :  { %83 = dma.done.wait [#allocation4], 128  }
  0x19   :  { %84 = vsyncadd [#allocation4], 4294967168 }
  0x1a   :  { %37 = vsyncpa [#allocation3], 1 }
  0x1b   :  { %38 = vsyncpa [#allocation4], 1 }

</bundles_post_ra>
